<compile_context>
chip_gen: v7x
topology: tpu7x:2x2x1
jax: 0.10.0
libtpu: 0.0.40
codegen_flags: <defaults>
</compile_context>

<pallas_src>
import jax
import jax.numpy as jnp
from jax.experimental import pallas as pl
from jax.experimental.pallas import tpu as pltpu


def vae_kernel(x_ref, w1_ref, b1_ref, w2_ref, b2_ref, o_ref):
    # encoder: z = relu(x @ W1 + b1)  -- bf16 MXU operands, f32 accumulate
    x = x_ref[...].astype(w1_ref.dtype)            # in-kernel f32 -> bf16 cast
    z = jnp.dot(x, w1_ref[...], preferred_element_type=jnp.float32)
    z = jnp.maximum(z + b1_ref[...], 0.0)          # (tb, L) f32
    # decoder: y = sigmoid(z @ W2 + b2)
    y = jnp.dot(z.astype(w2_ref.dtype), w2_ref[...],
                preferred_element_type=jnp.float32)
    o_ref[...] = jax.nn.sigmoid(y + b2_ref[...]).astype(o_ref.dtype)


def prepare_params(w1, b1, w2, b2, *, compute_dtype=jnp.bfloat16):
    """One-time preprocessing (hoisted out of the per-call wrapper):
    weights stored in bf16, biases as f32 row vectors.
      w1: (input_dim, latent)  b1: (latent,)
      w2: (latent, input_dim)  b2: (input_dim,)
    """
    # TODO(synk): for non-128-multiple feature dims (module default input_dim=1000),
    # lane-pad W1 rows / W2 cols / b2 to the next multiple of 128 here (and slice the
    # kernel output) to keep the unmasked lane-dense store path.
    D_in, L = w1.shape
    return (w1.astype(compute_dtype),
            b1.reshape(1, L).astype(jnp.float32),
            w2.astype(compute_dtype),
            b2.reshape(1, D_in).astype(jnp.float32))


def _pick_tile_b(B, tile_b, D_in, out_bytes, weight_bytes,
                 vmem_budget=24 * 1024 * 1024):
    """Batch tile: multiple of 8, divides B, gives >= 4 grid steps when the
    batch allows, and keeps double-buffered f32 x + out tiles plus the resident
    weights within the VMEM budget."""
    per_row = 2 * D_in * (4 + out_bytes)                  # 2x-buffered x + out rows
    cap = max(8, (vmem_budget - weight_bytes) // per_row)
    target = int(min(tile_b, cap, max(8, B // 4)))        # >= 4 steps if B allows
    target = max(8, (target // 8) * 8)
    for cand in range(target, 7, -8):                     # largest divisor of B
        if B % cand == 0:
            return cand
    return 8


def simple_vae_forward(x, params, *, tile_b=1024, out_dtype=None):
    """x: (B, input_dim) f32; params from prepare_params().
    Returns sigmoid(relu(x @ W1 + b1) @ W2 + b2), shape (B, input_dim)."""
    w1, b1, w2, b2 = params
    B, D_in = x.shape
    L = w1.shape[1]
    out_dtype = x.dtype if out_dtype is None else out_dtype

    # Minimal sublane alignment only (no full-tile batch pad).
    pad = (-B) % 8
    x_p = jnp.pad(x, ((0, pad), (0, 0))) if pad else x
    Bp = B + pad

    out_bytes = jnp.dtype(out_dtype).itemsize
    weight_bytes = 2 * (w1.size * w1.dtype.itemsize + w2.size * w2.dtype.itemsize)
    tb = _pick_tile_b(Bp, tile_b, D_in, out_bytes, weight_bytes)
    grid = Bp // tb

    out = pl.pallas_call(
        vae_kernel,
        out_shape=jax.ShapeDtypeStruct((Bp, D_in), out_dtype),
        grid_spec=pltpu.PrefetchScalarGridSpec(
            num_scalar_prefetch=0,
            grid=(grid,),
            in_specs=[
                pl.BlockSpec((tb, D_in), lambda i: (i, 0)),   # x tile (streamed, f32)
                pl.BlockSpec((D_in, L), lambda i: (0, 0)),    # W1 (resident, bf16)
                pl.BlockSpec((1, L), lambda i: (0, 0)),       # b1 (f32)
                pl.BlockSpec((L, D_in), lambda i: (0, 0)),    # W2 (resident, bf16)
                pl.BlockSpec((1, D_in), lambda i: (0, 0)),    # b2 (f32)
            ],
            out_specs=pl.BlockSpec((tb, D_in), lambda i: (i, 0)),
        ),
        compiler_params=pltpu.CompilerParams(
            dimension_semantics=(("parallel",) if grid >= 4 else ("arbitrary",)),
            vmem_limit_bytes=32 * 1024 * 1024),
    )(x_p, w1, b1, w2, b2)
    return out[:B] if pad else out


def init_params(key, input_dim, latent_dim, dtype=jnp.float32):
    # Deterministic PyTorch-style init: U(-1/sqrt(fan_in), 1/sqrt(fan_in)).
    k1, k2, k3, k4 = jax.random.split(key, 4)
    bound_enc = 1.0 / (input_dim ** 0.5)
    bound_dec = 1.0 / (latent_dim ** 0.5)
    w1 = jax.random.uniform(k1, (input_dim, latent_dim), dtype,
                            minval=-bound_enc, maxval=bound_enc)
    b1 = jax.random.uniform(k2, (latent_dim,), dtype,
                            minval=-bound_enc, maxval=bound_enc)
    w2 = jax.random.uniform(k3, (latent_dim, input_dim), dtype,
                            minval=-bound_dec, maxval=bound_dec)
    b2 = jax.random.uniform(k4, (input_dim,), dtype,
                            minval=-bound_dec, maxval=bound_dec)
    return w1, b1, w2, b2


if __name__ == "__main__":
    # Small, TPU-aligned stand-in for the module's (input_dim=1000, latent_dim=128):
    # input_dim=256, latent_dim=128, batch=512 -> tile_b heuristic picks tb=128,
    # giving a 4-step grid (pipelining; >=2 steps per v7x TensorCore).
    B, INPUT_DIM, LATENT_DIM = 512, 256, 128

    key = jax.random.PRNGKey(0)
    kx, kp = jax.random.split(key)
    x = jax.random.normal(kx, (B, INPUT_DIM), dtype=jnp.float32)
    w1, b1, w2, b2 = init_params(kp, INPUT_DIM, LATENT_DIM)
    params = prepare_params(w1, b1, w2, b2)

    out = simple_vae_forward(x, params)
    out = jax.block_until_ready(out)

    # Pure-JAX f32 reference; tolerance loosened for the bf16 operand path
    # (output is post-sigmoid, so absolute error stays small).
    z_ref = jnp.maximum(x @ w1 + b1, 0.0)
    y_ref = jax.nn.sigmoid(z_ref @ w2 + b2)
    assert out.shape == (B, INPUT_DIM)
    assert out.dtype == x.dtype
    err = float(jnp.max(jnp.abs(out - y_ref)))
    assert jnp.allclose(out, y_ref, atol=2e-2, rtol=0.0), err

    print("KERNEL_OK")
</pallas_src>

<mosaic_0001>
module attributes {stable_mosaic.version = 11 : i64} {
  func.func @vae_kernel(%arg0: i32, %arg1: memref<128x256xf32, #tpu.memory_space<vmem>>, %arg2: memref<256x128xbf16, #tpu.memory_space<vmem>>, %arg3: memref<1x128xf32, #tpu.memory_space<vmem>>, %arg4: memref<128x256xbf16, #tpu.memory_space<vmem>>, %arg5: memref<1x256xf32, #tpu.memory_space<vmem>>, %arg6: memref<128x256xf32, #tpu.memory_space<vmem>>) attributes {dimension_semantics = [#tpu.dimension_semantics<parallel>], iteration_bounds = array<i64: 4>, scalar_prefetch = 0 : i64, scratch_operands = 0 : i64, tpu.core_type = #tpu.core_type<tc>, window_params = [{transform_indices = @transform_0, window_bounds = array<i64: 128, 256>}, {pipeline_mode = #tpu.pipeline_mode<synchronous>, transform_indices = @transform_1, window_bounds = array<i64: 256, 128>}, {pipeline_mode = #tpu.pipeline_mode<synchronous>, transform_indices = @transform_2, window_bounds = array<i64: 1, 128>}, {pipeline_mode = #tpu.pipeline_mode<synchronous>, transform_indices = @transform_3, window_bounds = array<i64: 128, 256>}, {pipeline_mode = #tpu.pipeline_mode<synchronous>, transform_indices = @transform_4, window_bounds = array<i64: 1, 256>}, {transform_indices = @transform_5, window_bounds = array<i64: 128, 256>}]} {
    %c0 = arith.constant 0 : index
    %c0_0 = arith.constant 0 : index
    %0 = vector.load %arg1[%c0, %c0_0] : memref<128x256xf32, #tpu.memory_space<vmem>>, vector<128x256xf32>
    %1 = arith.truncf %0 : vector<128x256xf32> to vector<128x256xbf16>
    %c0_1 = arith.constant 0 : index
    %c0_2 = arith.constant 0 : index
    %2 = vector.load %arg2[%c0_1, %c0_2] : memref<256x128xbf16, #tpu.memory_space<vmem>>, vector<256x128xbf16>
    %cst = arith.constant dense<0.000000e+00> : vector<128x128xf32>
    %3 = tpu.matmul %1, %2, %cst {dimension_numbers = #tpu.dot_dimension_numbers<[1], [0], [0], [1], [0, 0, 1, 1], [], []>} : vector<128x256xbf16>, vector<256x128xbf16>, vector<128x128xf32> -> vector<128x128xf32>
    %c0_3 = arith.constant 0 : index
    %c0_4 = arith.constant 0 : index
    %4 = vector.load %arg3[%c0_3, %c0_4] : memref<1x128xf32, #tpu.memory_space<vmem>>, vector<1x128xf32>
    %5 = vector.broadcast %4 : vector<1x128xf32> to vector<128x128xf32>
    %6 = arith.addf %3, %5 : vector<128x128xf32>
    %cst_5 = arith.constant 0.000000e+00 : f32
    %7 = vector.broadcast %cst_5 : f32 to vector<128x128xf32>
    %8 = arith.maximumf %6, %7 : vector<128x128xf32>
    %9 = arith.truncf %8 : vector<128x128xf32> to vector<128x128xbf16>
    %c0_6 = arith.constant 0 : index
    %c0_7 = arith.constant 0 : index
    %10 = vector.load %arg4[%c0_6, %c0_7] : memref<128x256xbf16, #tpu.memory_space<vmem>>, vector<128x256xbf16>
    %cst_8 = arith.constant dense<0.000000e+00> : vector<128x256xf32>
    %11 = tpu.matmul %9, %10, %cst_8 {dimension_numbers = #tpu.dot_dimension_numbers<[1], [0], [0], [1], [0, 0, 1, 1], [], []>} : vector<128x128xbf16>, vector<128x256xbf16>, vector<128x256xf32> -> vector<128x256xf32>
    %c0_9 = arith.constant 0 : index
    %c0_10 = arith.constant 0 : index
    %12 = vector.load %arg5[%c0_9, %c0_10] : memref<1x256xf32, #tpu.memory_space<vmem>>, vector<1x256xf32>
    %13 = vector.broadcast %12 : vector<1x256xf32> to vector<128x256xf32>
    %14 = arith.addf %11, %13 : vector<128x256xf32>
    %15 = arith.negf %14 : vector<128x256xf32>
    %16 = math.exp %15 : vector<128x256xf32>
    %cst_11 = arith.constant 1.000000e+00 : f32
    %17 = vector.broadcast %cst_11 : f32 to vector<128x256xf32>
    %18 = arith.addf %17, %16 : vector<128x256xf32>
    %19 = arith.divf %17, %18 : vector<128x256xf32>
    %c0_12 = arith.constant 0 : index
    %c0_13 = arith.constant 0 : index
    %20 = vector.load %arg6[%c0_12, %c0_13] : memref<128x256xf32, #tpu.memory_space<vmem>>, vector<128x256xf32>
    tpu.vector_store %arg6[%c0_12, %c0_13], %19 {strides = array<i32>} : memref<128x256xf32, #tpu.memory_space<vmem>>, vector<128x256xf32>,
    return
  }
  func.func @transform_0(%arg0: i32) -> (i32, i32) {
    %c0_i32 = arith.constant 0 : i32
    %c0_i32_0 = arith.constant 0 : i32
    return %arg0, %c0_i32 : i32, i32
  }
  func.func @transform_1(%arg0: i32) -> (i32, i32) {
    %c0_i32 = arith.constant 0 : i32
    %c0_i32_0 = arith.constant 0 : i32
    %c0_i32_1 = arith.constant 0 : i32
    return %c0_i32, %c0_i32_0 : i32, i32
  }
  func.func @transform_2(%arg0: i32) -> (i32, i32) {
    %c0_i32 = arith.constant 0 : i32
    %c0_i32_0 = arith.constant 0 : i32
    %c0_i32_1 = arith.constant 0 : i32
    return %c0_i32, %c0_i32_0 : i32, i32
  }
  func.func @transform_3(%arg0: i32) -> (i32, i32) {
    %c0_i32 = arith.constant 0 : i32
    %c0_i32_0 = arith.constant 0 : i32
    %c0_i32_1 = arith.constant 0 : i32
    return %c0_i32, %c0_i32_0 : i32, i32
  }
  func.func @transform_4(%arg0: i32) -> (i32, i32) {
    %c0_i32 = arith.constant 0 : i32
    %c0_i32_0 = arith.constant 0 : i32
    %c0_i32_1 = arith.constant 0 : i32
    return %c0_i32, %c0_i32_0 : i32, i32
  }
  func.func @transform_5(%arg0: i32) -> (i32, i32) {
    %c0_i32 = arith.constant 0 : i32
    %c0_i32_0 = arith.constant 0 : i32
    return %arg0, %c0_i32 : i32, i32
  }
}

</mosaic_0001>

<bundles_post_ra>
// kernel: tpu_custom_call.1
= control target key start
LH: loop header
LB: loop body
LE: loop exit
PB: predicated region body
PF: predicated region fallthrough
CT: control target
= control target key end

     0   :  { %10 = vsyncpa [#allocation3], 0  ;;  %s2096_s0 = inlined_call_operand.hbm [shape: f32[512,256], index: 0, kind: input, shape index: {}]   ;;  %s2097_s1 = inlined_call_operand.hbm [shape: bf16[256,128], index: 1, kind: input, shape index: {}]   ;;  %s2098_s2 = inlined_call_operand.vmem [shape: f32[1,128], index: 2, kind: input, shape index: {}]   ;;  %s2099_s3 = inlined_call_operand.hbm [shape: bf16[128,256], index: 3, kind: input, shape index: {}]   ;;  %s2100_s4 = inlined_call_operand.vmem [shape: f32[1,256], index: 4, kind: input, shape index: {}]   ;;  %s2101_s5 = inlined_call_operand.hbm [shape: f32[512,256], index: 5, kind: output, shape index: {}]  }
   0x1   :  { %12 = vsyncpa [#allocation3 + $0x1], 0 }
   0x2   :  { %13 = vsyncpa [#allocation6], 0 }
   0x3   :  { %14 = vsyncpa [#allocation4], 0 }
   0x4   :  { %16 = vsyncpa [#allocation4 + $0x1], 0  ;;  %s1730_s18 = smov 0   ;;  %s1732_s19 = smov 0  }
   0x5   :  { %s1734_s20 = smov 0   ;;  %s1736_s21 = smov 0  }
   0x6 LB: > { %s1751_s22 = sadd.s32 4294967295, %s1685_s21   ;;  %s1132_s23 = sadd.s32 4294967294, %s1685_s21   ;;  %s1685_s21 = sphi %s1736_s21, %s2120_s21   ;;  %s1681_s20 = sphi %s1734_s20, %s2119_s20   ;;  %s1677_s19 = sphi %s1732_s19, %s2118_s19   ;;  %s1673_s18 = sphi %s1730_s18, %s2117_s18  }
   0x7   : > { %p42_p0 = scmp.ne.s32.totalorder %s1677_s19, %s1673_s18  ;;  %p2102_p1 = scmp.eq.s32.totalorder %s1751_s22, 0 }
   0x8   : > { %p156_p3 = scmp.eq.s32.totalorder %s1132_s23, 3  ;;  %p1133_p5 = scmp.ge.s32.totalorder %s1685_s21, 1 }
   0x9   : > { %p1760_p4 = por %p2102_p1, %p42_p0  ;;  %p163_p7 = scmp.lt.s32.totalorder %s1685_s21, 5 }
   0xa   : > { %p1765_p6 = por %p156_p3, %p42_p0  ;;  %s1687_s27 = smov [#allocation5]  }
   0xb   : > { %s2105_s24 = scalar_select %p1760_p4, 1, 0 }
   0xc   : > { %s2106_s25 = scalar_select %p1765_p6, 1, 0 }
   0xd   : > { %p1770_p8 = pnand %p1133_p5, %p163_p7  ;;  %s175_s28 = sshll.u32 %s1687_s27, 4  ;;  %s176_s28 = int_to_ptr.vmem [resolvable:$true] %s175_s28 }
   0xe   : > { %s1688_s30 = smov [#allocation7]   ;;  %s1529_s9 = scalar_lea.hbm %s2097_s1, 2048 }
   0xf   : > { %s2107_s26 = scalar_select %p1770_p8, 1, 0 }
  0x10   : > { %p1297_p9 = pneg %p1770_p8  ;;  %s191_s6 = sshll.u32 %s1688_s30, 4  ;;  %s1782_s6 = int_to_ptr.vmem [resolvable:$true] %s191_s6 }
  0x11   : > { %p1530_p11 = scmp.ne.s32.totalorder %s2097_s1, %s1529_s9  ;;  %p1536_p3 = scmp.lt.u32.totalorder %s1529_s9, %s2097_s1 }
  0x12   : > { %p1778_p10 = pnand %p1297_p9, %p2102_p1 }
  0x14   : > { %p1531_p12 = pneg %p1778_p10 }
  0x16   : > { %p1532_p13 = pnand %p1531_p12, %p1530_p11 }
  0x18   : > { %p1533_p0 = pneg %p1532_p13 }
  0x1a   : > { %p1538_p5 = pnand %p1536_p3, %p1533_p0 }
  0x1c   : > { %1541 = shalt.err (!%p1538_p5)
}
  0x1d   : > { %s1542_s14 = scalar_lea.vmem %s176_s28, 2048  ;;  %p1550_p2 = scmp.lt.s32.totalorder %s176_s28, %s176_s28 }
  0x1e   : > { %p1543_p7 = scmp.ne.s32.totalorder %s176_s28, %s1542_s14  ;;  %p1551_p6 = scmp.lt.s32.totalorder %s1542_s14, %s1542_s14 }
  0x20   : > { %p1545_p9 = pnand %p1543_p7, %p1531_p12  ;;  %p1552_p4 = por %p1551_p6, %p1550_p2 }
  0x22   : > { %p1546_p1 = pneg %p1545_p9 }
  0x24   : > { %p1553_p8 = pnand %p1552_p4, %p1546_p1 }
  0x26   : > { %1556 = shalt.err (!%p1553_p8)
}
  0x27   : > { %s1689_s15 = smov 64   ;;  %s1690_s16 = smov 4  }
  0x28   : > { %1300 = dma.hbm_to_vmem [thread:$0]  (!%p1778_p10), %s2097_s1, 2048, %s176_s28, [#allocation6], %s1689_s15, %s1689_s15, %s1690_s16  }
  0x29   : > { %s1557_s7 = scalar_lea.hbm %s2099_s3, 2048 }
  0x2a   : > { %p1558_p11 = scmp.ne.s32.totalorder %s2099_s3, %s1557_s7  ;;  %p1564_p4 = scmp.lt.u32.totalorder %s1557_s7, %s2099_s3 }
  0x2c   : > { %p1560_p1 = pnand %p1558_p11, %p1531_p12 }
  0x2e   : > { %p1561_p2 = pneg %p1560_p1 }
  0x30   : > { %p1566_p6 = pnand %p1564_p4, %p1561_p2 }
  0x32   : > { %1569 = shalt.err (!%p1566_p6)
}
  0x33   : > { %s1570_s28 = scalar_lea.vmem %s1782_s6, 2048  ;;  %p1578_p3 = scmp.lt.s32.totalorder %s1782_s6, %s1782_s6 }
  0x34   : > { %p1571_p8 = scmp.ne.s32.totalorder %s1782_s6, %s1570_s28  ;;  %p1579_p5 = scmp.lt.s32.totalorder %s1570_s28, %s1570_s28 }
  0x36   : > { %p1573_p13 = pnand %p1571_p8, %p1531_p12  ;;  %p1580_p7 = por %p1579_p5, %p1578_p3 }
  0x38   : > { %p1574_p0 = pneg %p1573_p13 }
  0x3a   : > { %p1581_p9 = pnand %p1580_p7, %p1574_p0 }
  0x3c   : > { %1584 = shalt.err (!%p1581_p9)
}
  0x3d   : > { %s1691_s12 = smov 128   ;;  %s1692_s13 = smov 8  }
  0x3e   : > { %1303 = dma.hbm_to_vmem [thread:$0]  (!%p1778_p10), %s2099_s3, 2048, %s1782_s6, [#allocation6], %s1691_s12, %s1691_s12, %s1692_s13  }
  0x3f   : > { %s1832_s16 = sadd.s32 1, %s1685_s21   ;;  %s29_s23 = sadd.s32 1, %s1681_s20 }
  0x40   : > { %s26_s17 = ssub.s32 %s1685_s21, %s1832_s16  ;;  %p36_p11 = scmp.ne.s32.totalorder %s1681_s20, %s1677_s19 }
  0x41   : > { %p27_p12 = scmp.eq.s32.totalorder %s26_s17, 0  ;;  %p37_p1 = scmp.eq.s32.totalorder %s1685_s21, 0 }
  0x42   : > { %p2109_p4 = scmp.eq.s32.totalorder %s1751_s22, 3  ;;  %p1314_p8 = scmp.lt.s32.totalorder %s1685_s21, 4 }
  0x43   : > { %s1841_s27 = scalar_select %p27_p12, %s1681_s20, %s29_s23  }
  0x44   : > { %p38_p2 = por %p37_p1, %p36_p11  ;;  %p1845_p6 = por %p2109_p4, %p36_p11 }
  0x45   : > { %s208_s29 = sand.u32 1, %s1681_s20   ;;  %s1218_s6 = sshll.u32 %s1685_s21, 12 }
  0x46   : > { %s1137_s7 = sshll.u32 %s208_s29, 8  ;;  %s1855_s10 = scalar_lea.hbm %s2096_s0, %s1218_s6 }
  0x47   : > { %s212_s11 = scalar_lea.vmem [#allocation2], %s1137_s7  ;;  %p1859_p10 = pnand %p1314_p8, %p38_p2 }
  0x48   : > { %s220_s28 = sshll.u32 %s212_s11, 4  ;;  %s1863_s13 = scalar_lea.sflag [#allocation3], %s208_s29  ;;  %s1857_s28 = int_to_ptr.vmem [resolvable:$true] %s220_s28 }
  0x49   : > { %s1585_s14 = scalar_lea.hbm %s1855_s10, 4096  ;;  %p1587_p0 = pneg %p1859_p10 }
  0x4a   : > { %p1586_p13 = scmp.ne.s32.totalorder %s1855_s10, %s1585_s14  ;;  %s1590_s23 = scalar_lea.hbm %s2096_s0, 16384 }
  0x4b   : > { %p1591_p7 = scmp.lt.u32.totalorder %s1855_s10, %s2096_s0  ;;  %p1592_p9 = scmp.lt.u32.totalorder %s1590_s23, %s1585_s14 }
  0x4c   : > { %p1588_p3 = pnand %p1587_p0, %p1586_p13  ;;  %p1594_p11 = scmp.lt.u32.totalorder %s1585_s14, %s1855_s10 }
  0x4d   : > { %p1593_p12 = por %p1592_p9, %p1591_p7 }
  0x4e   : > { %p1589_p5 = pneg %p1588_p3 }
  0x4f   : > { %p1595_p1 = por %p1594_p11, %p1593_p12 }
  0x51   : > { %p1596_p2 = pnand %p1595_p1, %p1589_p5 }
  0x53   : > { %1599 = shalt.err (!%p1596_p2)
}
  0x54   : > { %s1600_s29 = scalar_lea.vmem %s1857_s28, 4096  ;;  %s1693_s8 = smov [#allocation2]  }
  0x55   : > { %p1601_p4 = scmp.ne.s32.totalorder %s1857_s28, %s1600_s29  ;;  %s1605_s9 = sshll.u32 %s1693_s8, 4  ;;  %s1606_s9 = int_to_ptr.vmem [resolvable:$false] %s1605_s9 }
  0x56   : > { %s1607_s11 = scalar_lea.vmem %s1606_s9, 8192  ;;  %p1608_p3 = scmp.lt.s32.totalorder %s1857_s28, %s1606_s9 }
  0x57   : > { %p1603_p8 = pnand %p1601_p4, %p1587_p0  ;;  %p1609_p7 = scmp.lt.s32.totalorder %s1607_s11, %s1600_s29 }
  0x59   : > { %p1604_p13 = pneg %p1603_p8  ;;  %p1610_p9 = por %p1609_p7, %p1608_p3 }
  0x5b   : > { %p1611_p12 = pnand %p1610_p9, %p1604_p13 }
  0x5d   : > { %1614 = shalt.err (!%p1611_p12)
}
  0x5e   : > { %s1694_s14 = smov 256   ;;  %s1695_s15 = smov 16  }
  0x5f   : > { %1307 = dma.hbm_to_vmem [thread:$0]  (!%p1859_p10), %s1855_s10, 4096, %s1857_s28, %s1863_s13, %s1694_s14, %s1694_s14, %s1695_s15  }
  0x60   : > { %p2112_p0 = scmp.ne.s32.totalorder %s2107_s26, 0 }
  0x61   : > { %s1894_s17 = sand.u32 (!%p2112_p0), 1, %s1677_s19   ;;  %p2113_p5 = scmp.ne.s32.totalorder (!%p2112_p0), %s2105_s24, 0 }
  0x62   : > { %232 = sbr.rel (%p2112_p0) target bundleno = 682 (0x2aa), region = 40  ;;  %s1142_s23 = sshll.u32 (!%p2112_p0), %s1894_s17, 8 }
  0x63   : > { %s235_s7 = scalar_lea.sflag (!%p2112_p0), [#allocation3], %s1894_s17  ;;  %s1900_s6 = scalar_lea.vmem (!%p2112_p0), [#allocation2], %s1142_s23 }
  0x69   : > { %1660 = dma.done.wait (%p2113_p5), %s235_s7, 4096  }
  0x6a   : > { %1662 = vsyncadd (%p2113_p5), %s235_s7, 4294963200  ;;  %p2114_p10 = scmp.eq.s32.totalorder %s1751_s22, 0 }
  0x6c   : > { %1664 = dma.done.wait (%p2114_p10), [#allocation6], 4096   ;;  %p2115_p11 = pmov %p2114_p10 }
  0x6d   : > { %v1361_v0 = vld [vmem:[#allocation5 + $0x40] sm:$0xff]   ;;  %v1363_v2 = vld [vmem:[#allocation5 + $0x48] sm:$0xff]   ;;  %v1365_v4 = vld [vmem:[#allocation5 + $0x50] sm:$0xff]   ;;  %s1996_s12 = scalar_lea.vmem [#allocation8], %s1142_s23  ;;  %s1220_s13 = sshll.u32 %s1751_s22, 12 }
  0x6e   : > { %1666 = vsyncadd (%p2115_p11), [#allocation6], 4294963200  ;;  %v1362_v1 = vld [vmem:[#allocation5] sm:$0xff]   ;;  %1221 = vmatprep.subr.bf16.mxu0 %v1361_v0  ;;  %v1364_v3 = vld [vmem:[#allocation5 + $0x8] sm:$0xff]   ;;  %s1040_s29 = sshll.u32 %s1996_s12, 4  ;;  %s2048_s11 = scalar_lea.hbm %s2101_s5, %s1220_s13  ;;  %s2050_s29 = int_to_ptr.vmem [resolvable:$true] %s1040_s29 }
  0x6f   : > { %1222 = vmatpush3.bf16.msra.mxu0 %v1362_v1  ;;  %v1366_v5 = vld [vmem:[#allocation5 + $0x10] sm:$0xff]   ;;  %v1367_v6 = vld [vmem:[#allocation5 + $0x58] sm:$0xff]   ;;  %v1369_v8 = vld [vmem:[#allocation5 + $0x60] sm:$0xff]   ;;  %s1026_s22 = scalar_lea.sflag [#allocation4], %s1894_s17  ;;  %s1615_s14 = scalar_lea.vmem %s2050_s29, 4096 }
  0x70   : > { %1223 = vmatprep.subr.bf16.mxu0 %v1363_v2  ;;  %v1368_v7 = vld [vmem:[#allocation5 + $0x18] sm:$0xff]   ;;  %v1370_v9 = vld [vmem:[#allocation5 + $0x20] sm:$0xff]   ;;  %v1371_v10 = vld [vmem:[#allocation5 + $0x68] sm:$0xff]   ;;  %p1616_p1 = scmp.ne.s32.totalorder %s2050_s29, %s1615_s14  ;;  %s1697_s15 = smov [#allocation8]  }
  0x71   : > { %v277_v11 = vld [vmem:[%s1900_s6 + $0x8] sm:$0xff]  ;;  %v279_v12 = vld [vmem:[%s1900_s6 + $0x18] sm:$0xff]  ;;  %v1373_v15 = vld [vmem:[#allocation5 + $0x70] sm:$0xff]   ;;  %s1619_s23 = sshll.u32 %s1697_s15, 4  ;;  %s1620_s23 = int_to_ptr.vmem [resolvable:$false] %s1619_s23 }
  0x72   : > { %v309_v13 = vpack.c.bf16 %v279_v12, %v277_v11  ;;  %v1372_v14 = vld [vmem:[#allocation5 + $0x28] sm:$0xff]   ;;  %v1374_v16 = vld [vmem:[#allocation5 + $0x30] sm:$0xff]   ;;  %v1375_v17 = vld [vmem:[#allocation5 + $0x78] sm:$0xff]   ;;  %p1617_p2 = pnand %p1616_p1, %p1845_p6  ;;  %s1621_s7 = scalar_lea.vmem %s1620_s23, 8192 }
  0x73   : > { %1224 = vmatpush3.bf16.msra.mxu0 %v1364_v3  ;;  %v1376_v18 = vld [vmem:[#allocation5 + $0x38] sm:$0xff]   ;;  %v276_v19 = vld [vmem:[%s1900_s6] sm:$0xff]  ;;  %v278_v20 = vld [vmem:[%s1900_s6 + $0x10] sm:$0xff]  ;;  %p1622_p8 = scmp.lt.s32.totalorder %s2050_s29, %s1620_s23  ;;  %p1623_p13 = scmp.lt.s32.totalorder %s1621_s7, %s1615_s14 }
  0x74   : > { %1225 = vmatprep.subr.bf16.mxu0 %v1365_v4  ;;  %491 = vmatprep.mubr.bf16.mxu0 %v309_v13  ;;  %v281_v21 = vld [vmem:[%s1900_s6 + $0x28] sm:$0xff]  ;;  %v283_v22 = vld [vmem:[%s1900_s6 + $0x38] sm:$0xff]  ;;  %v308_v26 = vpack.c.bf16 %v278_v20, %v276_v19  ;;  %v280_v30 = vld [vmem:[%s1900_s6 + $0x20] sm:$0xff]  ;;  %p1618_p4 = pneg %p1617_p2 }
  0x75   : > { %v1377_v23 = vld [vmem:[#allocation7 + $0x4] ss:$8 sps:$4 sm:$0xff]   ;;  %v1379_v24 = vld [vmem:[#allocation7] ss:$8 sps:$4 sm:$0xff]   ;;  %v1380_v25 = vld [vmem:[#allocation7 + $0x14] ss:$8 sps:$4 sm:$0xff]   ;;  %v311_v28 = vpack.c.bf16 %v283_v22, %v281_v21  ;;  %p1624_p3 = por %p1623_p13, %p1622_p8 }
  0x76   : > { %688 = vmatprep.subr.bf16.mxu1 %v1377_v23  ;;  %v1382_v27 = vld [vmem:[#allocation7 + $0x10] ss:$8 sps:$4 sm:$0xff]   ;;  %v1383_v29 = vld [vmem:[#allocation7 + $0x24] ss:$8 sps:$4 sm:$0xff]   ;;  %v1385_v31 = vld [vmem:[#allocation7 + $0x20] ss:$8 sps:$4 sm:$0xff]  }
  0x77   : > { %1226 = vmatpush3.bf16.msra.mxu0 %v1366_v5  ;;  %689 = vmatpush1.bf16.msra.mxu1 %v1379_v24  ;;  %v282_v32 = vld [vmem:[%s1900_s6 + $0x30] sm:$0xff]  ;;  %v285_v34 = vld [vmem:[%s1900_s6 + $0x48] sm:$0xff]  ;;  %v287_v35 = vld [vmem:[%s1900_s6 + $0x58] sm:$0xff]  ;;  %p1625_p7 = pnand %p1624_p3, %p1618_p4 }
  0x78   : > { %1227 = vmatprep.subr.bf16.mxu0 %v1367_v6  ;;  %690 = vmatprep.subr.bf16.mxu1 %v1380_v25  ;;  %v1386_v33 = vld [vmem:[#allocation7 + $0x34] ss:$8 sps:$4 sm:$0xff]   ;;  %v310_v36 = vpack.c.bf16 %v282_v32, %v280_v30  ;;  %v1388_v37 = vld [vmem:[#allocation7 + $0x30] ss:$8 sps:$4 sm:$0xff]   ;;  %v313_v38 = vpack.c.bf16 %v287_v35, %v285_v34  ;;  %v1389_v39 = vld [vmem:[#allocation7 + $0x44] ss:$8 sps:$4 sm:$0xff]  }
  0x79   : > { %v1391_v40 = vld [vmem:[#allocation7 + $0x40] ss:$8 sps:$4 sm:$0xff]   ;;  %v286_v42 = vld [vmem:[%s1900_s6 + $0x50] sm:$0xff]  ;;  %v291_v44 = vld [vmem:[%s1900_s6 + $0x78] sm:$0xff] }
  0x7a   : > { %v284_v41 = vld [vmem:[%s1900_s6 + $0x40] sm:$0xff]  ;;  %v289_v43 = vld [vmem:[%s1900_s6 + $0x68] sm:$0xff]  ;;  %v290_v48 = vld [vmem:[%s1900_s6 + $0x70] sm:$0xff] }
  0x7b   : > { %1228 = vmatpush3.bf16.msra.mxu0 %v1368_v7  ;;  %691 = vmatpush1.bf16.msra.mxu1 %v1382_v27  ;;  %v312_v45 = vpack.c.bf16 %v286_v42, %v284_v41  ;;  %v315_v46 = vpack.c.bf16 %v291_v44, %v289_v43  ;;  %v288_v47 = vld [vmem:[%s1900_s6 + $0x60] sm:$0xff]  ;;  %v293_v49 = vld [vmem:[%s1900_s6 + $0x88] sm:$0xff]  ;;  %v295_v50 = vld [vmem:[%s1900_s6 + $0x98] sm:$0xff] }
  0x7c   : > { %1229 = vmatprep.subr.bf16.mxu0 %v1369_v8  ;;  %692 = vmatprep.subr.bf16.mxu1 %v1383_v29  ;;  %v314_v51 = vpack.c.bf16 %v290_v48, %v288_v47  ;;  %v317_v52 = vpack.c.bf16 %v295_v50, %v293_v49  ;;  %v292_v53 = vld [vmem:[%s1900_s6 + $0x80] sm:$0xff]  ;;  %v294_v54 = vld [vmem:[%s1900_s6 + $0x90] sm:$0xff]  ;;  %v297_v55 = vld [vmem:[%s1900_s6 + $0xa8] sm:$0xff] }
  0x7d   : > { %v299_v56 = vld [vmem:[%s1900_s6 + $0xb8] sm:$0xff]  ;;  %v316_v57 = vpack.c.bf16 %v294_v54, %v292_v53  ;;  %v296_v59 = vld [vmem:[%s1900_s6 + $0xa0] sm:$0xff]  ;;  %v298_v60 = vld [vmem:[%s1900_s6 + $0xb0] sm:$0xff] }
  0x7e   : > { %v319_v58 = vpack.c.bf16 %v299_v56, %v297_v55  ;;  %v301_v61 = vld [vmem:[%s1900_s6 + $0xc8] sm:$0xff]  ;;  %v303_v62 = vld [vmem:[%s1900_s6 + $0xd8] sm:$0xff]  ;;  %v318_v63 = vpack.c.bf16 %v298_v60, %v296_v59  ;;  %v300_v1 = vld [vmem:[%s1900_s6 + $0xc0] sm:$0xff] }
  0x7f   : > { %1230 = vmatpush3.bf16.msra.mxu0 %v1370_v9  ;;  %693 = vmatpush1.bf16.msra.mxu1 %v1385_v31  ;;  %v321_v0 = vpack.c.bf16 %v303_v62, %v301_v61  ;;  %v302_v2 = vld [vmem:[%s1900_s6 + $0xd0] sm:$0xff]  ;;  %v305_v3 = vld [vmem:[%s1900_s6 + $0xe8] sm:$0xff]  ;;  %v307_v4 = vld [vmem:[%s1900_s6 + $0xf8] sm:$0xff] }
  0x80   : > { %1231 = vmatprep.subr.bf16.mxu0 %v1371_v10  ;;  %694 = vmatprep.subr.bf16.mxu1 %v1386_v33  ;;  %v320_v5 = vpack.c.bf16 %v302_v2, %v300_v1  ;;  %v323_v6 = vpack.c.bf16 %v307_v4, %v305_v3  ;;  %v304_v7 = vld [vmem:[%s1900_s6 + $0xe0] sm:$0xff]  ;;  %v306_v8 = vld [vmem:[%s1900_s6 + $0xf0] sm:$0xff] }
  0x81   : > { %v322_v9 = vpack.c.bf16 %v306_v8, %v304_v7  ;;  %v1392_v10 = vld [vmem:[#allocation7 + $0x54] ss:$8 sps:$4 sm:$0xff]   ;;  %v1394_v11 = vld [vmem:[#allocation7 + $0x50] ss:$8 sps:$4 sm:$0xff]   ;;  %v1395_v12 = vld [vmem:[#allocation7 + $0x64] ss:$8 sps:$4 sm:$0xff]  }
  0x82   : > { %v1397_v13 = vld [vmem:[#allocation7 + $0x60] ss:$8 sps:$4 sm:$0xff]  }
  0x83   : > { %1232 = vmatpush3.bf16.msra.mxu0 %v1372_v14  ;;  %695 = vmatpush1.bf16.msra.mxu1 %v1388_v37  ;;  %v1398_v14 = vld [vmem:[#allocation7 + $0x74] ss:$8 sps:$4 sm:$0xff]  }
  0x84   : > { %1233 = vmatprep.subr.bf16.mxu0 %v1373_v15  ;;  %696 = vmatprep.subr.bf16.mxu1 %v1389_v39  ;;  %v1400_v15 = vld [vmem:[#allocation7 + $0x70] ss:$8 sps:$4 sm:$0xff]  }
  0x87   : > { %1234 = vmatpush3.bf16.msra.mxu0 %v1374_v16  ;;  %697 = vmatpush1.bf16.msra.mxu1 %v1391_v40  ;;  %v1696_v16 = vmov 0  }
  0x88   : > { %1235 = vmatprep.subr.bf16.mxu0 %v1375_v17  ;;  %698 = vmatprep.subr.bf16.mxu1 %v1392_v10 }
  0x89   : > { %720 = vmatprep.mubr.bf16.mxu1 %v1696_v16 }
  0x8b   : > { %1236 = vmatpush3.bf16.msra.mxu0 %v1376_v18  ;;  %699 = vmatpush1.bf16.msra.mxu1 %v1394_v11  ;;  %v1946_v18 = vld [vmem:[%s2098_s2] ss:$0 sm:$0xff] }
  0x8c   : > { %700 = vmatprep.subr.bf16.mxu1 %v1395_v12 }
  0x8e   : > { %492 = vmatmul.mubr.bf16.vlgmr.msra.gmra.mrb[0].mxu0 %v308_v26 }
  0x8f   : > { %499 = vmatprep.mubr.bf16.mxu0 %v311_v28  ;;  %701 = vmatpush1.bf16.msra.mxu1 %v1397_v13 }
  0x90   : > { %702 = vmatprep.subr.bf16.mxu1 %v1398_v14 }
  0x93   : > { %703 = vmatpush1.bf16.msra.mxu1 %v1400_v15 }
  0x96   : > { %500 = vmatmul.mubr.bf16.gmra.mrb[4].mxu0 %v310_v36 }
  0x97   : > { %507 = vmatprep.mubr.bf16.mxu0 %v313_v38 }
  0x9e   : > { %508 = vmatmul.mubr.bf16.gmra.mrb[8].mxu0 %v312_v45 }
  0x9f   : > { %515 = vmatprep.mubr.bf16.mxu0 %v315_v46 }
  0xa6   : > { %516 = vmatmul.mubr.bf16.gmra.mrb[12].mxu0 %v314_v51 }
  0xa7   : > { %523 = vmatprep.mubr.bf16.mxu0 %v317_v52 }
  0xae   : > { %524 = vmatmul.mubr.bf16.gmra.mrb[16].mxu0 %v316_v57 }
  0xaf   : > { %531 = vmatprep.mubr.bf16.mxu0 %v319_v58 }
  0xb6   : > { %532 = vmatmul.mubr.bf16.gmra.mrb[20].mxu0 %v318_v63 }
  0xb7   : > { %539 = vmatprep.mubr.bf16.mxu0 %v321_v0 }
  0xbe   : > { %540 = vmatmul.mubr.bf16.gmra.mrb[24].mxu0 %v320_v5 }
  0xbf   : > { %547 = vmatprep.mubr.bf16.mxu0 %v323_v6 }
  0xc6   : > { %548 = vmatmul.mubr.bf16.gmra.mrb[28].mxu0 %v322_v9 }
 0x161   : > { %v1237_v17 = vpop.f32.mrb[0].mxu0 }
 0x162   : > { %v1238_v19 = vpop.f32.mrb[1].mxu0 }
 0x163   : > { %v1239_v20 = vadd.f32 %v1238_v19, %v1237_v17  ;;  %v1240_v21 = vpop.f32.mrb[2].mxu0 }
 0x164   : > { %v1241_v22 = vpop.f32.mrb[3].mxu0 }
 0x165   : > { %v494_v23 = vadd.f32 %v1239_v20, %v1946_v18  ;;  %v1242_v24 = vadd.f32 %v1241_v22, %v1240_v21 }
 0x167   : > { %v497_v25 = vadd.f32 %v1242_v24, %v1946_v18  ;;  %v556_v26 = vmax.f32 %v494_v23, 0.0 }
 0x169   : > { %v557_v27 = vmax.f32 %v497_v25, 0.0  ;;  %v1243_v28 = vpop.f32.mrb[4].mxu0 }
 0x16a   : > { %v1244_v29 = vpop.f32.mrb[5].mxu0 }
 0x16b   : > { %v1245_v30 = vadd.f32 %v1244_v29, %v1243_v28  ;;  %v1246_v31 = vpop.f32.mrb[6].mxu0  ;;  %v572_v32 = vpack.c.bf16 %v557_v27, %v556_v26 }
 0x16c   : > { %v1247_v33 = vpop.f32.mrb[7].mxu0 }
 0x16d   : > { %v502_v34 = vadd.f32 %v1245_v30, %v1946_v18  ;;  %v1248_v35 = vadd.f32 %v1247_v33, %v1246_v31  ;;  %721 = vmatmul.mubr.bf16.vlgmr.msra.gmra.mrb[0].mxu1 %v572_v32 }
 0x16e   : > { %730 = vmatprep.mubr.bf16.mxu1 %v1696_v16 }
 0x16f   : > { %v505_v36 = vadd.f32 %v1248_v35, %v1946_v18  ;;  %v558_v37 = vmax.f32 %v502_v34, 0.0 }
 0x171   : > { %v559_v38 = vmax.f32 %v505_v36, 0.0  ;;  %v1249_v39 = vpop.f32.mrb[8].mxu0 }
 0x172   : > { %v1250_v40 = vpop.f32.mrb[9].mxu0 }
 0x173   : > { %v1251_v41 = vadd.f32 %v1250_v40, %v1249_v39  ;;  %v1252_v42 = vpop.f32.mrb[10].mxu0  ;;  %v573_v43 = vpack.c.bf16 %v559_v38, %v558_v37 }
 0x174   : > { %v1253_v44 = vpop.f32.mrb[11].mxu0 }
 0x175   : > { %v510_v45 = vadd.f32 %v1251_v41, %v1946_v18  ;;  %v1254_v46 = vadd.f32 %v1253_v44, %v1252_v42  ;;  %731 = vmatmul.mubr.bf16.gmra.mrb[4].mxu1 %v573_v43  ;;  %v598_v44 = vlaneseq }
 0x176   : > { %740 = vmatprep.mubr.bf16.mxu1 %v1696_v16 }
 0x177   : > { %v513_v47 = vadd.f32 %v1254_v46, %v1946_v18  ;;  %v560_v48 = vmax.f32 %v510_v45, 0.0  ;;  %v599_v45 = vshrl.u32 %v598_v44, 7 }
 0x179   : > { %v561_v49 = vmax.f32 %v513_v47, 0.0  ;;  %v1255_v50 = vpop.f32.mrb[12].mxu0  ;;  %v600_v46 = vsub.s32 0, %v599_v45  ;;  %v596_v47 = vld [vmem:[%s2100_s4] sm:$0x3] }
 0x17a   : > { %v1256_v51 = vpop.f32.mrb[13].mxu0 }
 0x17b   : > { %v1257_v52 = vadd.f32 %v1256_v51, %v1255_v50  ;;  %v1258_v53 = vpop.f32.mrb[14].mxu0  ;;  %v574_v54 = vpack.c.bf16 %v561_v49, %v560_v48  ;;  %v604_v48 = vsub.s32 1, %v599_v45  ;;  %v1974_v49 = vrot.slane %v596_v47, %v600_v46 }
 0x17c   : > { %v1259_v55 = vpop.f32.mrb[15].mxu0 }
 0x17d   : > { %v518_v56 = vadd.f32 %v1257_v52, %v1946_v18  ;;  %v1260_v57 = vadd.f32 %v1259_v55, %v1258_v53  ;;  %741 = vmatmul.mubr.bf16.gmra.mrb[8].mxu1 %v574_v54  ;;  %v1976_v50 = vrot.slane %v596_v47, %v604_v48 }
 0x17e   : > { %750 = vmatprep.mubr.bf16.mxu1 %v1696_v16 }
 0x17f   : > { %v521_v58 = vadd.f32 %v1260_v57, %v1946_v18  ;;  %v562_v59 = vmax.f32 %v518_v56, 0.0 }
 0x181   : > { %v563_v60 = vmax.f32 %v521_v58, 0.0  ;;  %v1261_v61 = vpop.f32.mrb[16].mxu0 }
 0x182   : > { %v1262_v62 = vpop.f32.mrb[17].mxu0 }
 0x183   : > { %v1263_v63 = vadd.f32 %v1262_v62, %v1261_v61  ;;  %v1264_v0 = vpop.f32.mrb[18].mxu0  ;;  %v575_v1 = vpack.c.bf16 %v563_v60, %v562_v59 }
 0x184   : > { %v1265_v2 = vpop.f32.mrb[19].mxu0 }
 0x185   : > { %v526_v3 = vadd.f32 %v1263_v63, %v1946_v18  ;;  %v1266_v4 = vadd.f32 %v1265_v2, %v1264_v0  ;;  %751 = vmatmul.mubr.bf16.gmra.mrb[12].mxu1 %v575_v1 }
 0x186   : > { %760 = vmatprep.mubr.bf16.mxu1 %v1696_v16 }
 0x187   : > { %v529_v5 = vadd.f32 %v1266_v4, %v1946_v18  ;;  %v564_v6 = vmax.f32 %v526_v3, 0.0 }
 0x189   : > { %v565_v7 = vmax.f32 %v529_v5, 0.0  ;;  %v1267_v8 = vpop.f32.mrb[20].mxu0 }
 0x18a   : > { %v1268_v9 = vpop.f32.mrb[21].mxu0 }
 0x18b   : > { %v1269_v10 = vadd.f32 %v1268_v9, %v1267_v8  ;;  %v1270_v11 = vpop.f32.mrb[22].mxu0  ;;  %v576_v12 = vpack.c.bf16 %v565_v7, %v564_v6 }
 0x18c   : > { %v1271_v13 = vpop.f32.mrb[23].mxu0 }
 0x18d   : > { %v534_v14 = vadd.f32 %v1269_v10, %v1946_v18  ;;  %v1272_v15 = vadd.f32 %v1271_v13, %v1270_v11  ;;  %761 = vmatmul.mubr.bf16.gmra.mrb[16].mxu1 %v576_v12 }
 0x18e   : > { %770 = vmatprep.mubr.bf16.mxu1 %v1696_v16 }
 0x18f   : > { %v537_v17 = vadd.f32 %v1272_v15, %v1946_v18  ;;  %v566_v19 = vmax.f32 %v534_v14, 0.0 }
 0x191   : > { %v567_v20 = vmax.f32 %v537_v17, 0.0  ;;  %v1273_v21 = vpop.f32.mrb[24].mxu0 }
 0x192   : > { %v1274_v22 = vpop.f32.mrb[25].mxu0 }
 0x193   : > { %v1275_v23 = vadd.f32 %v1274_v22, %v1273_v21  ;;  %v1276_v24 = vpop.f32.mrb[26].mxu0  ;;  %v577_v25 = vpack.c.bf16 %v567_v20, %v566_v19 }
 0x194   : > { %v1277_v26 = vpop.f32.mrb[27].mxu0 }
 0x195   : > { %v542_v27 = vadd.f32 %v1275_v23, %v1946_v18  ;;  %v1278_v28 = vadd.f32 %v1277_v26, %v1276_v24  ;;  %771 = vmatmul.mubr.bf16.gmra.mrb[20].mxu1 %v577_v25 }
 0x196   : > { %780 = vmatprep.mubr.bf16.mxu1 %v1696_v16 }
 0x197   : > { %v545_v29 = vadd.f32 %v1278_v28, %v1946_v18  ;;  %v568_v30 = vmax.f32 %v542_v27, 0.0 }
 0x199   : > { %v569_v31 = vmax.f32 %v545_v29, 0.0  ;;  %v1279_v32 = vpop.f32.mrb[28].mxu0 }
 0x19a   : > { %v1280_v33 = vpop.f32.mrb[29].mxu0 }
 0x19b   : > { %v1281_v34 = vadd.f32 %v1280_v33, %v1279_v32  ;;  %v1282_v35 = vpop.f32.mrb[30].mxu0  ;;  %v578_v36 = vpack.c.bf16 %v569_v31, %v568_v30 }
 0x19c   : > { %v1283_v37 = vpop.f32.mrb[31].mxu0 }
 0x19d   : > { %v550_v38 = vadd.f32 %v1281_v34, %v1946_v18  ;;  %v1284_v39 = vadd.f32 %v1283_v37, %v1282_v35  ;;  %781 = vmatmul.mubr.bf16.gmra.mrb[24].mxu1 %v578_v36 }
 0x19e   : > { %790 = vmatprep.mubr.bf16.mxu1 %v1696_v16 }
 0x19f   : > { %v553_v40 = vadd.f32 %v1284_v39, %v1946_v18  ;;  %v570_v41 = vmax.f32 %v550_v38, 0.0 }
 0x1a1   : > { %v571_v42 = vmax.f32 %v553_v40, 0.0 }
 0x1a3   : > { %v579_v43 = vpack.c.bf16 %v571_v42, %v570_v41 }
 0x1a5   : > { %791 = vmatmul.mubr.bf16.gmra.mrb[28].mxu1 %v579_v43 }
 0x240   : > { %v722_v51 = vpop.f32.mrb[0].mxu1 }
 0x241   : > { %v723_v16 = vadd.f32 %v722_v51, %v1974_v49  ;;  %v724_v18 = vpop.f32.mrb[1].mxu1 }
 0x242   : > { %v725_v52 = vadd.f32 %v724_v18, %v1976_v50  ;;  %v726_v53 = vpop.f32.mrb[2].mxu1 }
 0x243   : > { %v1179_v54 = vmul.f32 -1.442695, %v723_v16  ;;  %v727_v55 = vadd.f32 %v726_v53, %v1974_v49  ;;  %v728_v56 = vpop.f32.mrb[3].mxu1 }
 0x244   : > { %v1180_v57 = vmul.f32 -1.442695, %v725_v52  ;;  %v729_v58 = vadd.f32 %v728_v56, %v1976_v50 }
 0x245   : > { %1401 = vpow2.f32 %v1179_v54  ;;  %v1181_v59 = vmul.f32 -1.442695, %v727_v55 }
 0x246   : > { %1403 = vpow2.f32 %v1180_v57  ;;  %v1182_v60 = vmul.f32 -1.442695, %v729_v58 }
 0x247   : > { %1405 = vpow2.f32 %v1181_v59 }
 0x248   : > { %1407 = vpow2.f32 %v1182_v60  ;;  %v732_v61 = vpop.f32.mrb[4].mxu1 }
 0x249   : > { %v733_v62 = vadd.f32 %v732_v61, %v1974_v49  ;;  %v734_v63 = vpop.f32.mrb[5].mxu1 }
 0x24a   : > { %v735_v0 = vadd.f32 %v734_v63, %v1976_v50  ;;  %v736_v1 = vpop.f32.mrb[6].mxu1 }
 0x24b   : > { %v1183_v2 = vmul.f32 -1.442695, %v733_v62  ;;  %v737_v3 = vadd.f32 %v736_v1, %v1974_v49  ;;  %v738_v4 = vpop.f32.mrb[7].mxu1 }
 0x24c   : > { %v1184_v5 = vmul.f32 -1.442695, %v735_v0  ;;  %v739_v6 = vadd.f32 %v738_v4, %v1976_v50 }
 0x24d   : > { %1409 = vpow2.f32 %v1183_v2  ;;  %v1185_v7 = vmul.f32 -1.442695, %v737_v3 }
 0x24e   : > { %1411 = vpow2.f32 %v1184_v5  ;;  %v1186_v8 = vmul.f32 -1.442695, %v739_v6 }
 0x24f   : > { %v1402_v9 = vpop.eup %1401  ;;  %1413 = vpow2.f32 %v1185_v7 }
 0x250   : > { %v1404_v10 = vpop.eup %1403  ;;  %v897_v11 = vadd.f32 1.0, %v1402_v9  ;;  %1415 = vpow2.f32 %v1186_v8  ;;  %v742_v12 = vpop.f32.mrb[8].mxu1 }
 0x251   : > { %v1406_v13 = vpop.eup %1405  ;;  %v898_v14 = vadd.f32 1.0, %v1404_v10  ;;  %v743_v15 = vadd.f32 %v742_v12, %v1974_v49  ;;  %v744_v17 = vpop.f32.mrb[9].mxu1 }
 0x252   : > { %v1408_v19 = vpop.eup %1407  ;;  %1417 = vrcp.f32 %v897_v11  ;;  %v899_v20 = vadd.f32 1.0, %v1406_v13  ;;  %v745_v21 = vadd.f32 %v744_v17, %v1976_v50  ;;  %v746_v22 = vpop.f32.mrb[10].mxu1 }
 0x253   : > { %1419 = vrcp.f32 %v898_v14  ;;  %v900_v23 = vadd.f32 1.0, %v1408_v19  ;;  %v1187_v24 = vmul.f32 -1.442695, %v743_v15  ;;  %v747_v25 = vadd.f32 %v746_v22, %v1974_v49  ;;  %v748_v26 = vpop.f32.mrb[11].mxu1 }
 0x254   : > { %1421 = vrcp.f32 %v899_v20  ;;  %v1188_v27 = vmul.f32 -1.442695, %v745_v21  ;;  %v749_v28 = vadd.f32 %v748_v26, %v1976_v50 }
 0x255   : > { %1423 = vrcp.f32 %v900_v23  ;;  %v1189_v29 = vmul.f32 -1.442695, %v747_v25 }
 0x256   : > { %1425 = vpow2.f32 %v1187_v24  ;;  %v1190_v30 = vmul.f32 -1.442695, %v749_v28 }
 0x257   : > { %v1410_v31 = vpop.eup %1409  ;;  %1427 = vpow2.f32 %v1188_v27 }
 0x258   : > { %v1412_v32 = vpop.eup %1411  ;;  %v901_v33 = vadd.f32 1.0, %v1410_v31  ;;  %1429 = vpow2.f32 %v1189_v29  ;;  %v752_v34 = vpop.f32.mrb[12].mxu1 }
 0x259   : > { %v1414_v35 = vpop.eup %1413  ;;  %v902_v36 = vadd.f32 1.0, %v1412_v32  ;;  %1431 = vpow2.f32 %v1190_v30  ;;  %v753_v37 = vadd.f32 %v752_v34, %v1974_v49  ;;  %v754_v38 = vpop.f32.mrb[13].mxu1 }
 0x25a   : > { %v1416_v39 = vpop.eup %1415  ;;  %1433 = vrcp.f32 %v901_v33  ;;  %v903_v40 = vadd.f32 1.0, %v1414_v35  ;;  %v755_v41 = vadd.f32 %v754_v38, %v1976_v50  ;;  %v756_v42 = vpop.f32.mrb[14].mxu1 }
 0x25b   : > { %1435 = vrcp.f32 %v902_v36  ;;  %v904_v43 = vadd.f32 1.0, %v1416_v39  ;;  %v1191_v44 = vmul.f32 -1.442695, %v753_v37  ;;  %v757_v45 = vadd.f32 %v756_v42, %v1974_v49  ;;  %v758_v46 = vpop.f32.mrb[15].mxu1 }
 0x25c   : > { %v1418_v47 = vpop.eup %1417  ;;  %1437 = vrcp.f32 %v903_v40  ;;  %v1192_v48 = vmul.f32 -1.442695, %v755_v41  ;;  %v759_v51 = vadd.f32 %v758_v46, %v1976_v50 }
 0x25d   : > { %v1420_v16 = vpop.eup %1419  ;;  %993 = vst [vmem:[%s1996_s12] sm:$0xff] %v1418_v47  ;;  %1439 = vrcp.f32 %v904_v43  ;;  %v1193_v18 = vmul.f32 -1.442695, %v757_v45 }
 0x25e   : > { %v1422_v52 = vpop.eup %1421  ;;  %994 = vst [vmem:[%s1996_s12 + $0x8] sm:$0xff] %v1420_v16  ;;  %1441 = vpow2.f32 %v1191_v44  ;;  %v1194_v53 = vmul.f32 -1.442695, %v759_v51 }
 0x25f   : > { %v1424_v54 = vpop.eup %1423  ;;  %995 = vst [vmem:[%s1996_s12 + $0x10] sm:$0xff] %v1422_v52  ;;  %1443 = vpow2.f32 %v1192_v48 }
 0x260   : > { %v1426_v55 = vpop.eup %1425  ;;  %996 = vst [vmem:[%s1996_s12 + $0x18] sm:$0xff] %v1424_v54  ;;  %1445 = vpow2.f32 %v1193_v18  ;;  %v762_v56 = vpop.f32.mrb[16].mxu1 }
 0x261   : > { %v1428_v57 = vpop.eup %1427  ;;  %v905_v58 = vadd.f32 1.0, %v1426_v55  ;;  %1447 = vpow2.f32 %v1194_v53  ;;  %v763_v59 = vadd.f32 %v762_v56, %v1974_v49  ;;  %v764_v60 = vpop.f32.mrb[17].mxu1 }
 0x262   : > { %v1430_v61 = vpop.eup %1429  ;;  %v906_v62 = vadd.f32 1.0, %v1428_v57  ;;  %v765_v63 = vadd.f32 %v764_v60, %v1976_v50  ;;  %v766_v0 = vpop.f32.mrb[18].mxu1 }
 0x263   : > { %v1432_v1 = vpop.eup %1431  ;;  %1449 = vrcp.f32 %v905_v58  ;;  %v907_v2 = vadd.f32 1.0, %v1430_v61  ;;  %v1195_v3 = vmul.f32 -1.442695, %v763_v59  ;;  %v767_v4 = vadd.f32 %v766_v0, %v1974_v49  ;;  %v768_v5 = vpop.f32.mrb[19].mxu1 }
 0x264   : > { %v1434_v6 = vpop.eup %1433  ;;  %1451 = vrcp.f32 %v906_v62  ;;  %v908_v7 = vadd.f32 1.0, %v1432_v1  ;;  %v1196_v8 = vmul.f32 -1.442695, %v765_v63  ;;  %v769_v9 = vadd.f32 %v768_v5, %v1976_v50 }
 0x265   : > { %v1436_v10 = vpop.eup %1435  ;;  %997 = vst [vmem:[%s1996_s12 + $0x20] sm:$0xff] %v1434_v6  ;;  %1453 = vrcp.f32 %v907_v2  ;;  %v1197_v11 = vmul.f32 -1.442695, %v767_v4 }
 0x266   : > { %v1438_v12 = vpop.eup %1437  ;;  %998 = vst [vmem:[%s1996_s12 + $0x28] sm:$0xff] %v1436_v10  ;;  %1455 = vrcp.f32 %v908_v7  ;;  %v1198_v13 = vmul.f32 -1.442695, %v769_v9 }
 0x267   : > { %v1440_v14 = vpop.eup %1439  ;;  %999 = vst [vmem:[%s1996_s12 + $0x30] sm:$0xff] %v1438_v12  ;;  %1457 = vpow2.f32 %v1195_v3 }
 0x268   : > { %v1442_v15 = vpop.eup %1441  ;;  %1000 = vst [vmem:[%s1996_s12 + $0x38] sm:$0xff] %v1440_v14  ;;  %1459 = vpow2.f32 %v1196_v8  ;;  %v772_v17 = vpop.f32.mrb[20].mxu1 }
 0x269   : > { %v1444_v19 = vpop.eup %1443  ;;  %v909_v20 = vadd.f32 1.0, %v1442_v15  ;;  %1461 = vpow2.f32 %v1197_v11  ;;  %v773_v21 = vadd.f32 %v772_v17, %v1974_v49  ;;  %v774_v22 = vpop.f32.mrb[21].mxu1 }
 0x26a   : > { %v1446_v23 = vpop.eup %1445  ;;  %v910_v24 = vadd.f32 1.0, %v1444_v19  ;;  %1463 = vpow2.f32 %v1198_v13  ;;  %v775_v25 = vadd.f32 %v774_v22, %v1976_v50  ;;  %v776_v26 = vpop.f32.mrb[22].mxu1 }
 0x26b   : > { %v1448_v27 = vpop.eup %1447  ;;  %1465 = vrcp.f32 %v909_v20  ;;  %v911_v28 = vadd.f32 1.0, %v1446_v23  ;;  %v1199_v29 = vmul.f32 -1.442695, %v773_v21  ;;  %v777_v30 = vadd.f32 %v776_v26, %v1974_v49  ;;  %v778_v31 = vpop.f32.mrb[23].mxu1 }
 0x26c   : > { %1467 = vrcp.f32 %v910_v24  ;;  %v912_v32 = vadd.f32 1.0, %v1448_v27  ;;  %v1200_v33 = vmul.f32 -1.442695, %v775_v25  ;;  %v779_v34 = vadd.f32 %v778_v31, %v1976_v50 }
 0x26d   : > { %v1450_v35 = vpop.eup %1449  ;;  %1469 = vrcp.f32 %v911_v28  ;;  %v1201_v36 = vmul.f32 -1.442695, %v777_v30 }
 0x26e   : > { %v1452_v37 = vpop.eup %1451  ;;  %1001 = vst [vmem:[%s1996_s12 + $0x40] sm:$0xff] %v1450_v35  ;;  %1471 = vrcp.f32 %v912_v32  ;;  %v1202_v38 = vmul.f32 -1.442695, %v779_v34 }
 0x26f   : > { %v1454_v39 = vpop.eup %1453  ;;  %1002 = vst [vmem:[%s1996_s12 + $0x48] sm:$0xff] %v1452_v37  ;;  %1473 = vpow2.f32 %v1199_v29 }
 0x270   : > { %v1456_v40 = vpop.eup %1455  ;;  %1003 = vst [vmem:[%s1996_s12 + $0x50] sm:$0xff] %v1454_v39  ;;  %1475 = vpow2.f32 %v1200_v33  ;;  %v782_v41 = vpop.f32.mrb[24].mxu1 }
 0x271   : > { %v1458_v42 = vpop.eup %1457  ;;  %1004 = vst [vmem:[%s1996_s12 + $0x58] sm:$0xff] %v1456_v40  ;;  %1477 = vpow2.f32 %v1201_v36  ;;  %v783_v43 = vadd.f32 %v782_v41, %v1974_v49  ;;  %v784_v44 = vpop.f32.mrb[25].mxu1 }
 0x272   : > { %v1460_v45 = vpop.eup %1459  ;;  %v913_v46 = vadd.f32 1.0, %v1458_v42  ;;  %1479 = vpow2.f32 %v1202_v38  ;;  %v785_v47 = vadd.f32 %v784_v44, %v1976_v50  ;;  %v786_v48 = vpop.f32.mrb[26].mxu1 }
 0x273   : > { %v1462_v51 = vpop.eup %1461  ;;  %v914_v16 = vadd.f32 1.0, %v1460_v45  ;;  %v787_v18 = vadd.f32 %v786_v48, %v1974_v49  ;;  %v788_v52 = vpop.f32.mrb[27].mxu1  ;;  %v1203_v55 = vmul.f32 -1.442695, %v783_v43 }
 0x274   : > { %v1464_v53 = vpop.eup %1463  ;;  %1481 = vrcp.f32 %v913_v46  ;;  %v915_v54 = vadd.f32 1.0, %v1462_v51  ;;  %v789_v56 = vadd.f32 %v788_v52, %v1976_v50  ;;  %v1204_v59 = vmul.f32 -1.442695, %v785_v47 }
 0x275   : > { %v1466_v57 = vpop.eup %1465  ;;  %1483 = vrcp.f32 %v914_v16  ;;  %v916_v58 = vadd.f32 1.0, %v1464_v53  ;;  %v1205_v61 = vmul.f32 -1.442695, %v787_v18 }
 0x276   : > { %v1468_v60 = vpop.eup %1467  ;;  %1005 = vst [vmem:[%s1996_s12 + $0x60] sm:$0xff] %v1466_v57  ;;  %1485 = vrcp.f32 %v915_v54  ;;  %v1206_v63 = vmul.f32 -1.442695, %v789_v56 }
 0x277   : > { %v1470_v62 = vpop.eup %1469  ;;  %1006 = vst [vmem:[%s1996_s12 + $0x68] sm:$0xff] %v1468_v60  ;;  %1487 = vrcp.f32 %v916_v58 }
 0x278   : > { %v1472_v0 = vpop.eup %1471  ;;  %1007 = vst [vmem:[%s1996_s12 + $0x70] sm:$0xff] %v1470_v62  ;;  %1489 = vpow2.f32 %v1203_v55  ;;  %v792_v1 = vpop.f32.mrb[28].mxu1 }
 0x279   : > { %v1474_v2 = vpop.eup %1473  ;;  %1008 = vst [vmem:[%s1996_s12 + $0x78] sm:$0xff] %v1472_v0  ;;  %1491 = vpow2.f32 %v1204_v59  ;;  %v793_v3 = vadd.f32 %v792_v1, %v1974_v49  ;;  %v794_v4 = vpop.f32.mrb[29].mxu1 }
 0x27a   : > { %v1476_v5 = vpop.eup %1475  ;;  %v917_v6 = vadd.f32 1.0, %v1474_v2  ;;  %1493 = vpow2.f32 %v1205_v61  ;;  %v795_v7 = vadd.f32 %v794_v4, %v1976_v50  ;;  %v796_v8 = vpop.f32.mrb[30].mxu1 }
 0x27b   : > { %v1478_v9 = vpop.eup %1477  ;;  %v918_v10 = vadd.f32 1.0, %v1476_v5  ;;  %1495 = vpow2.f32 %v1206_v63  ;;  %v797_v11 = vadd.f32 %v796_v8, %v1974_v49  ;;  %v798_v12 = vpop.f32.mrb[31].mxu1  ;;  %v1207_v15 = vmul.f32 -1.442695, %v793_v3 }
 0x27c   : > { %v1480_v13 = vpop.eup %1479  ;;  %1497 = vrcp.f32 %v917_v6  ;;  %v919_v14 = vadd.f32 1.0, %v1478_v9  ;;  %v799_v17 = vadd.f32 %v798_v12, %v1976_v50  ;;  %v1208_v20 = vmul.f32 -1.442695, %v795_v7 }
 0x27d   : > { %1499 = vrcp.f32 %v918_v10  ;;  %v920_v19 = vadd.f32 1.0, %v1480_v13  ;;  %v1209_v22 = vmul.f32 -1.442695, %v797_v11 }
 0x27e   : > { %v1482_v21 = vpop.eup %1481  ;;  %1501 = vrcp.f32 %v919_v14  ;;  %v1210_v49 = vmul.f32 -1.442695, %v799_v17 }
 0x27f   : > { %v1484_v23 = vpop.eup %1483  ;;  %1009 = vst [vmem:[%s1996_s12 + $0x80] sm:$0xff] %v1482_v21  ;;  %1503 = vrcp.f32 %v920_v19 }
 0x280   : > { %v1486_v24 = vpop.eup %1485  ;;  %1010 = vst [vmem:[%s1996_s12 + $0x88] sm:$0xff] %v1484_v23  ;;  %1505 = vpow2.f32 %v1207_v15 }
 0x281   : > { %v1488_v25 = vpop.eup %1487  ;;  %1011 = vst [vmem:[%s1996_s12 + $0x90] sm:$0xff] %v1486_v24  ;;  %1507 = vpow2.f32 %v1208_v20 }
 0x282   : > { %v1490_v26 = vpop.eup %1489  ;;  %1012 = vst [vmem:[%s1996_s12 + $0x98] sm:$0xff] %v1488_v25  ;;  %1509 = vpow2.f32 %v1209_v22 }
 0x283   : > { %v1492_v50 = vpop.eup %1491  ;;  %v921_v27 = vadd.f32 1.0, %v1490_v26  ;;  %1511 = vpow2.f32 %v1210_v49 }
 0x284   : > { %v1494_v28 = vpop.eup %1493  ;;  %v922_v29 = vadd.f32 1.0, %v1492_v50 }
 0x285   : > { %v1496_v30 = vpop.eup %1495  ;;  %1513 = vrcp.f32 %v921_v27  ;;  %v923_v31 = vadd.f32 1.0, %v1494_v28 }
 0x286   : > { %v1498_v32 = vpop.eup %1497  ;;  %1515 = vrcp.f32 %v922_v29  ;;  %v924_v33 = vadd.f32 1.0, %v1496_v30 }
 0x287   : > { %v1500_v34 = vpop.eup %1499  ;;  %1013 = vst [vmem:[%s1996_s12 + $0xa0] sm:$0xff] %v1498_v32  ;;  %1517 = vrcp.f32 %v923_v31 }
 0x288   : > { %v1502_v35 = vpop.eup %1501  ;;  %1014 = vst [vmem:[%s1996_s12 + $0xa8] sm:$0xff] %v1500_v34  ;;  %1519 = vrcp.f32 %v924_v33 }
 0x289   : > { %v1504_v36 = vpop.eup %1503  ;;  %1015 = vst [vmem:[%s1996_s12 + $0xb0] sm:$0xff] %v1502_v35 }
 0x28a   : > { %v1506_v37 = vpop.eup %1505  ;;  %1016 = vst [vmem:[%s1996_s12 + $0xb8] sm:$0xff] %v1504_v36 }
 0x28b   : > { %v1508_v38 = vpop.eup %1507  ;;  %v925_v39 = vadd.f32 1.0, %v1506_v37 }
 0x28c   : > { %v1510_v40 = vpop.eup %1509  ;;  %v926_v41 = vadd.f32 1.0, %v1508_v38 }
 0x28d   : > { %v1512_v42 = vpop.eup %1511  ;;  %1521 = vrcp.f32 %v925_v39  ;;  %v927_v43 = vadd.f32 1.0, %v1510_v40 }
 0x28e   : > { %1523 = vrcp.f32 %v926_v41  ;;  %v928_v44 = vadd.f32 1.0, %v1512_v42 }
 0x28f   : > { %v1514_v45 = vpop.eup %1513  ;;  %1525 = vrcp.f32 %v927_v43 }
 0x290   : > { %v1516_v46 = vpop.eup %1515  ;;  %1017 = vst [vmem:[%s1996_s12 + $0xc0] sm:$0xff] %v1514_v45  ;;  %1527 = vrcp.f32 %v928_v44 }
 0x291   : > { %v1518_v47 = vpop.eup %1517  ;;  %1018 = vst [vmem:[%s1996_s12 + $0xc8] sm:$0xff] %v1516_v46 }
 0x292   : > { %v1520_v48 = vpop.eup %1519  ;;  %1019 = vst [vmem:[%s1996_s12 + $0xd0] sm:$0xff] %v1518_v47 }
 0x293   : > { %1020 = vst [vmem:[%s1996_s12 + $0xd8] sm:$0xff] %v1520_v48 }
 0x297   : > { %v1522_v51 = vpop.eup %1521 }
 0x298   : > { %v1524_v16 = vpop.eup %1523  ;;  %1021 = vst [vmem:[%s1996_s12 + $0xe0] sm:$0xff] %v1522_v51 }
 0x299   : > { %v1526_v18 = vpop.eup %1525  ;;  %1022 = vst [vmem:[%s1996_s12 + $0xe8] sm:$0xff] %v1524_v16 }
 0x29a   : > { %v1528_v52 = vpop.eup %1527  ;;  %1023 = vst [vmem:[%s1996_s12 + $0xf0] sm:$0xff] %v1526_v18 }
 0x29b   : > { %1024 = vst [vmem:[%s1996_s12 + $0xf8] sm:$0xff] %v1528_v52 }
 0x29c   : > { %1628 = shalt.err (!%p1625_p7)
}
 0x29d   : > { %s1629_s6 = scalar_lea.hbm %s2048_s11, 4096  ;;  %s1633_s10 = scalar_lea.hbm %s2101_s5, 16384 }
 0x29e   : > { %p1630_p9 = scmp.ne.s32.totalorder %s2048_s11, %s1629_s6  ;;  %p1634_p5 = scmp.lt.u32.totalorder %s2048_s11, %s2101_s5 }
 0x29f   : > { %p1635_p10 = scmp.lt.u32.totalorder %s1633_s10, %s1629_s6  ;;  %p1637_p1 = scmp.lt.u32.totalorder %s1629_s6, %s2048_s11 }
 0x2a0   : > { %p1631_p12 = pnand %p1630_p9, %p1845_p6 }
 0x2a1   : > { %p1636_p11 = por %p1635_p10, %p1634_p5 }
 0x2a2   : > { %p1632_p0 = pneg %p1631_p12 }
 0x2a3   : > { %p1638_p2 = por %p1637_p1, %p1636_p11 }
 0x2a5   : > { %p1639_p4 = pnand %p1638_p2, %p1632_p0 }
 0x2a7   : > { %1642 = shalt.err (!%p1639_p4)
}
 0x2a8   : > { %s1698_s13 = smov 256   ;;  %s1699_s8 = smov 16  }
 0x2a9   : > { %1295 = dma.vmem_to_hbm [thread:$0]  (%p1845_p6), %s2050_s29, 4096, %s2048_s11, %s1026_s22, %s1698_s13, %s1698_s13, %s1699_s8  }
 0x2aa PF: > { %p1317_p8 = scmp.ge.s32.totalorder %s1685_s21, 2  ;;  %s1055_s9 = sand.u32 1, %s1673_s18  }
 0x2ab   : > { %p2116_p13 = scmp.ne.s32.totalorder %s2106_s25, 0  ;;  %s1056_s14 = scalar_lea.sflag [#allocation4], %s1055_s9 }
 0x2ad   : > { %p1309_p3 = pnand %p1317_p8, %p2116_p13 }
 0x2af   : > { %1668 = dma.done.wait (!%p1309_p3), %s1056_s14, 4096  }
 0x2b0   : > { %1670 = vsyncadd (!%p1309_p3), %s1056_s14, 4294963200  ;;  %p19_p7 = scmp.ge.s32.totalorder %s1832_s16, 6   ;;  %s2117_s18 = smov %s1677_s19 }
 0x2b1   : > { %s2118_s19 = smov %s1681_s20  ;;  %s2119_s20 = smov %s1841_s27 }
 0x2b2   : > { %s2120_s21 = smov %s1832_s16  ;;  %21 = sbr.rel (!%p19_p7) target bundleno = 6 (0x6), region = 93 }
 0x2b9   :  { %1061 = vsyncpa [#allocation3], 1 }
 0x2ba   :  { %1063 = vsyncpa [#allocation3 + $0x1], 1 }
 0x2bb   :  { %1064 = vsyncpa [#allocation6], 1 }
 0x2bc   :  { %1065 = vsyncpa [#allocation4], 1 }
 0x2bd   :  { %1067 = vsyncpa [#allocation4 + $0x1], 1 }

</bundles_post_ra>
